<compile_context>
chip_gen: v6e
topology: v6e:2x2x1
jax: 0.10.0
libtpu: 0.0.40
codegen_flags: <defaults>
</compile_context>

<pallas_src>
import jax
import jax.numpy as jnp
from jax.experimental import pallas as pl
from jax.experimental.pallas import tpu as pltpu


def norm_lstmc_seq_kernel(c_ref, h0_ref, c0_ref, rowp_ref, wcat_ref, o_ref,
                          h_sc, c_sc, mean_sc, istd_sc):
    """One (b, t) grid step: one LSTMCell step + head, state carried in VMEM."""
    t = pl.program_id(1)
    m, _ = c_ref.shape                       # (M, N): c already transposed
    dim = h0_ref.shape[-1]
    wtot = wcat_ref.shape[1]                 # 128-aligned w_hh block + dim

    # cl1 = ||c||_1 along the original dim 0 -> lane-dense reduce to (M, 1).
    cl1 = jnp.sum(jnp.abs(c_ref[...].astype(jnp.float32)), axis=1, keepdims=True)

    @pl.when(t == 0)
    def _():
        # Init recurrent state + cache normalizers from the first step's c
        # (PyTorch caches cl1.mean()/cl1.std() on the first forward call).
        h_sc[...] = h0_ref[...].astype(jnp.float32)
        c_sc[...] = c0_ref[...].astype(jnp.float32)
        mean = jnp.sum(cl1) / m
        var = jnp.sum((cl1 - mean) ** 2) / (m - 1)      # Bessel (torch.std)
        mean_sc[...] = jnp.full((m, 1), mean, jnp.float32)
        istd_sc[...] = jnp.full((m, 1), 1.0 / jnp.sqrt(var), jnp.float32)

    # Normalized LSTM input (M, 1) using the cached normalizers.
    x = (cl1 - mean_sc[...]) * istd_sc[...]

    h0 = h_sc[...]
    c0 = c_sc[...]

    # Packed row params (gate order already [i, f, o, g]).
    w_ih_row = rowp_ref[0:1, :]                          # (1, 4*dim)
    b_gates = rowp_ref[1:2, :]                           # (1, 4*dim)
    b_lll = rowp_ref[2:3, 0:dim]                         # (1, dim)
    b_lin = rowp_ref[3:4, 0:2]                           # (1, 2)
    w_lin0 = rowp_ref[4:5, 0:dim]                        # (1, dim)
    w_lin1 = rowp_ref[5:6, 0:dim]                        # (1, dim)

    # Packed (dim, *) weights: w_hh^T at lane 0, w_lll^T on a 128-lane boundary.
    w_hh_t = wcat_ref[:, 0:4 * dim]                      # (dim, 4*dim)
    w_lll_t = wcat_ref[:, wtot - dim:wtot]               # (dim, dim), aligned

    # LSTMCell gates: outer(x, w_ih) + h @ W_hh^T + (b_ih + b_hh).
    gates = (x * w_ih_row
             + jnp.dot(h0, w_hh_t, preferred_element_type=jnp.float32)
             + b_gates)                                  # (M, 4*dim)

    sig = jax.nn.sigmoid(gates[:, 0:3 * dim])            # [i | f | o], one EUP pass
    g_g = jnp.tanh(gates[:, 3 * dim:4 * dim])
    i_g = sig[:, 0:dim]
    f_g = sig[:, dim:2 * dim]
    o_g = sig[:, 2 * dim:3 * dim]

    c1 = f_g * c0 + i_g * g_g
    h1 = o_g * jnp.tanh(c1)

    # out = softplus(linear(relu(lll(c1))))
    y = jnp.maximum(
        jnp.dot(c1, w_lll_t, preferred_element_type=jnp.float32) + b_lll, 0.0)
    # (M, 2) linear on VPU/XLU (broadcast-multiply + lane reduce); MXU skipped.
    z0 = jnp.sum(y * w_lin0, axis=1, keepdims=True)
    z1 = jnp.sum(y * w_lin1, axis=1, keepdims=True)
    z = jnp.concatenate([z0, z1], axis=1) + b_lin        # (M, 2)
    # PyTorch Softplus(beta=1, threshold=20)
    out = jnp.where(z > 20.0, z, jnp.log1p(jnp.exp(jnp.minimum(z, 20.0))))

    # Carry state for the next step.
    h_sc[...] = h1
    c_sc[...] = c1

    # Three static slice stores into the lane-dense output tile (no concat/pad).
    o_ref[:, 0:dim] = h1
    o_ref[:, dim:2 * dim] = c1
    o_ref[:, 2 * dim:2 * dim + 2] = out


def prepare_params(params):
    """One-time packing of the constant parameters. Run once, reuse every call."""
    dim = params["w_hh"].shape[1]

    def reorder(w):  # PyTorch LSTMCell gate order [i, f, g, o] -> [i, f, o, g]
        i, f, g, o = jnp.split(w, 4, axis=0)
        return jnp.concatenate([i, f, o, g], axis=0)

    w_ih = reorder(params["w_ih"]).reshape(4 * dim)             # (4*dim,)
    b_gates = reorder(params["b_ih"] + params["b_hh"])          # (4*dim,)
    w_hh_t = jnp.transpose(reorder(params["w_hh"]))             # (dim, 4*dim)
    w_lll_t = jnp.transpose(params["w_lll"])                    # (dim, dim)

    width = 4 * dim

    def padrow(v):
        return jnp.zeros((width,), jnp.float32).at[:v.shape[0]].set(v)

    rows = jnp.stack([
        w_ih, b_gates,
        padrow(params["b_lll"]), padrow(params["b_lin"]),
        padrow(params["w_lin"][0]), padrow(params["w_lin"][1]),
    ], axis=0)                                                  # (6, 4*dim)
    rowp = jnp.zeros((8, width), jnp.float32).at[0:6, :].set(rows)  # sublane-pad

    # Put w_lll^T on a 128-lane tile boundary so its in-kernel slice never
    # straddles a lane tile (avoids a hidden VMEM relayout for odd dims).
    gw_pad = ((4 * dim + 127) // 128) * 128
    wcat = jnp.zeros((dim, gw_pad + dim), jnp.float32)
    wcat = wcat.at[:, 0:4 * dim].set(w_hh_t).at[:, gw_pad:gw_pad + dim].set(w_lll_t)
    return jax.device_put(rowp), jax.device_put(wcat)


@jax.jit
def norm_lstmc_rollout(c_seq, h0, c0, rowp, wcat):
    """Run T recurrent NormLSTMC steps for B independent sequences in ONE kernel.

    c_seq: (B, T, N, M) — per-step c in the PyTorch (N, M) layout.
    h0, c0: (B, M, dim) initial hidden / cell state.
    Returns (out_seq (B,T,M,2), h_seq (B,T,M,dim), c_seq_out (B,T,M,dim)).
    """
    c_mn = jnp.swapaxes(c_seq, -1, -2)            # one transpose for the whole rollout
    B, T, M, N = c_mn.shape
    dim = h0.shape[-1]
    assert M >= 2, "NormLSTMC normalizer std requires M >= 2"
    out_w = max(128, ((2 * dim + 2 + 127) // 128) * 128)   # lane-dense packed width

    grid_spec = pltpu.PrefetchScalarGridSpec(
        num_scalar_prefetch=0,
        grid=(B, T),
        in_specs=[
            pl.BlockSpec((None, None, M, N), lambda b, t: (b, t, 0, 0)),
            pl.BlockSpec((None, M, dim), lambda b, t: (b, 0, 0)),
            pl.BlockSpec((None, M, dim), lambda b, t: (b, 0, 0)),
            pl.BlockSpec(rowp.shape, lambda b, t: (0, 0)),   # constant -> DMA once
            pl.BlockSpec(wcat.shape, lambda b, t: (0, 0)),   # constant -> DMA once
        ],
        out_specs=pl.BlockSpec((None, None, M, out_w), lambda b, t: (b, t, 0, 0)),
        scratch_shapes=[
            pltpu.VMEM((M, dim), jnp.float32),   # h carry
            pltpu.VMEM((M, dim), jnp.float32),   # c carry
            pltpu.VMEM((M, 1), jnp.float32),     # cached cl1 mean
            pltpu.VMEM((M, 1), jnp.float32),     # cached 1/cl1 std
        ],
    )

    packed = pl.pallas_call(
        norm_lstmc_seq_kernel,
        out_shape=jax.ShapeDtypeStruct((B, T, M, out_w), jnp.float32),
        grid_spec=grid_spec,
        compiler_params=pltpu.CompilerParams(
            dimension_semantics=("parallel", "arbitrary")),  # batch parallel, T sequential
    )(c_mn, h0, c0, rowp, wcat)

    h_seq = packed[..., 0:dim]
    c_out = packed[..., dim:2 * dim]
    out_seq = packed[..., 2 * dim:2 * dim + 2]
    return out_seq, h_seq, c_out


def norm_lstmc_reference(c_seq, h0, c0, params):
    """Plain-JAX reference of the PyTorch forward, rolled out over T steps.

    Normalizers are initialized from step 0's c and cached (PyTorch semantics).
    c_seq: (T, N, M); h0, c0: (M, dim).
    """
    dim = h0.shape[1]
    T = c_seq.shape[0]
    h, cst = h0, c0
    mean = std = None
    outs, hs, cs = [], [], []
    for t in range(T):
        c = c_seq[t]
        cl1 = jnp.sum(jnp.abs(c), axis=0)                   # torch.norm(c, dim=0, p=1)
        if t == 0:
            mean = jnp.mean(cl1)
            std = jnp.sqrt(jnp.sum((cl1 - mean) ** 2) / (cl1.shape[0] - 1))
        x = ((cl1 - mean) / std)[:, None]                   # stack(...).T -> (M, 1)

        gates = (x @ params["w_ih"].T + params["b_ih"]
                 + h @ params["w_hh"].T + params["b_hh"])
        i_g = jax.nn.sigmoid(gates[:, 0 * dim:1 * dim])
        f_g = jax.nn.sigmoid(gates[:, 1 * dim:2 * dim])
        g_g = jnp.tanh(gates[:, 2 * dim:3 * dim])
        o_g = jax.nn.sigmoid(gates[:, 3 * dim:4 * dim])
        cst = f_g * cst + i_g * g_g
        h = o_g * jnp.tanh(cst)

        y = jnp.maximum(cst @ params["w_lll"].T + params["b_lll"], 0.0)
        z = y @ params["w_lin"].T + params["b_lin"]
        out = jnp.where(z > 20.0, z, jnp.log1p(jnp.exp(jnp.minimum(z, 20.0))))
        outs.append(out)
        hs.append(h)
        cs.append(cst)
    return jnp.stack(outs), jnp.stack(hs), jnp.stack(cs)


if __name__ == "__main__":
    # B independent rollouts of T steps; per step c: (N, M); LSTM batch = M.
    B, T, N, M, DIM = 2, 8, 16, 8, 32
    key = jax.random.PRNGKey(0)
    keys = jax.random.split(key, 12)

    # deterministic synthetic parameters (shapes per nn.LSTMCell(1, DIM),
    # nn.Linear(DIM, DIM), nn.Linear(DIM, 2), hidden/cellstate params of size DIM)
    params = {
        "w_ih":  0.1 * jax.random.normal(keys[0], (4 * DIM, 1), jnp.float32),
        "w_hh":  0.1 * jax.random.normal(keys[1], (4 * DIM, DIM), jnp.float32),
        "b_ih":  0.1 * jax.random.normal(keys[2], (4 * DIM,), jnp.float32),
        "b_hh":  0.1 * jax.random.normal(keys[3], (4 * DIM,), jnp.float32),
        "w_lll": 0.1 * jax.random.normal(keys[4], (DIM, DIM), jnp.float32),
        "b_lll": 0.1 * jax.random.normal(keys[5], (DIM,), jnp.float32),
        "w_lin": 0.1 * jax.random.normal(keys[6], (2, DIM), jnp.float32),
        "b_lin": 0.1 * jax.random.normal(keys[7], (2,), jnp.float32),
    }
    hidden_param = jax.random.normal(keys[8], (DIM,), jnp.float32)
    cell_param = jax.random.normal(keys[9], (DIM,), jnp.float32)

    # inputs: `b` is unused by the PyTorch forward; (hidden, cellstate) from get_initial
    c_seq = jax.random.normal(keys[10], (B, T, N, M), jnp.float32)
    h0 = jnp.broadcast_to(hidden_param[None, None, :], (B, M, DIM)).astype(jnp.float32)
    c0 = jnp.broadcast_to(cell_param[None, None, :], (B, M, DIM)).astype(jnp.float32)

    # one-time constant preprocessing (hoisted out of the per-call path)
    rowp, wcat = prepare_params(params)

    out_seq, h_seq, c_out = norm_lstmc_rollout(c_seq, h0, c0, rowp, wcat)
    jax.block_until_ready((out_seq, h_seq, c_out))

    assert out_seq.shape == (B, T, M, 2)
    assert h_seq.shape == (B, T, M, DIM) and c_out.shape == (B, T, M, DIM)

    for b in range(B):
        out_r, h_r, c_r = norm_lstmc_reference(c_seq[b], h0[b], c0[b], params)
        assert jnp.allclose(out_seq[b], out_r, rtol=1e-5, atol=1e-5)
        assert jnp.allclose(h_seq[b], h_r, rtol=1e-5, atol=1e-5)
        assert jnp.allclose(c_out[b], c_r, rtol=1e-5, atol=1e-5)

    # TODO(synk): if M grows, additionally batch independent cells along M so the
    # MXU LHS has >=128 rows per pass; at M=8 the matmuls remain latency-bound.
    print("KERNEL_OK")
</pallas_src>

<mosaic_0001>
module attributes {stable_mosaic.version = 11 : i64} {
  func.func @norm_lstmc_seq_kernel(%arg0: i32, %arg1: i32, %arg2: memref<1x1x8x16xf32, #tpu.memory_space<vmem>>, %arg3: memref<1x8x32xf32, #tpu.memory_space<vmem>>, %arg4: memref<1x8x32xf32, #tpu.memory_space<vmem>>, %arg5: memref<8x128xf32, #tpu.memory_space<vmem>>, %arg6: memref<32x160xf32, #tpu.memory_space<vmem>>, %arg7: memref<1x1x8x128xf32, #tpu.memory_space<vmem>>, %arg8: memref<8x32xf32, #tpu.memory_space<vmem>>, %arg9: memref<8x32xf32, #tpu.memory_space<vmem>>, %arg10: memref<8x1xf32, #tpu.memory_space<vmem>>, %arg11: memref<8x1xf32, #tpu.memory_space<vmem>>) attributes {dimension_semantics = [#tpu.dimension_semantics<parallel>, #tpu.dimension_semantics<arbitrary>], iteration_bounds = array<i64: 2, 8>, scalar_prefetch = 0 : i64, scratch_operands = 4 : i64, tpu.core_type = #tpu.core_type<tc>, window_params = [{transform_indices = @transform_0, window_bounds = array<i64: 1, 1, 8, 16>}, {transform_indices = @transform_1, window_bounds = array<i64: 1, 8, 32>}, {transform_indices = @transform_2, window_bounds = array<i64: 1, 8, 32>}, {pipeline_mode = #tpu.pipeline_mode<synchronous>, transform_indices = @transform_3, window_bounds = array<i64: 8, 128>}, {pipeline_mode = #tpu.pipeline_mode<synchronous>, transform_indices = @transform_4, window_bounds = array<i64: 32, 160>}, {transform_indices = @transform_5, window_bounds = array<i64: 1, 1, 8, 128>}]} {
    %c0 = arith.constant 0 : index
    %c0_0 = arith.constant 0 : index
    %c0_1 = arith.constant 0 : index
    %c0_2 = arith.constant 0 : index
    %0 = vector.load %arg2[%c0, %c0_0, %c0_1, %c0_2] : memref<1x1x8x16xf32, #tpu.memory_space<vmem>>, vector<1x1x8x16xf32>
    %1 = vector.shape_cast %0 : vector<1x1x8x16xf32> to vector<8x16xf32>
    %2 = math.absf %1 : vector<8x16xf32>
    %cst = arith.constant dense<0.000000e+00> : vector<8xf32>
    %3 = vector.multi_reduction <add>, %2, %cst [1] : vector<8x16xf32> to vector<8xf32>
    %4 = vector.shape_cast %3 : vector<8xf32> to vector<8x1xf32>
    %c0_i32 = arith.constant 0 : i32
    %5 = arith.cmpi eq, %arg1, %c0_i32 : i32
    %6 = arith.extui %5 : i1 to i32
    %c0_i32_3 = arith.constant 0 : i32
    %7 = arith.cmpi ne, %6, %c0_i32_3 : i32
    scf.if %7 {
      %c0_44 = arith.constant 0 : index
      %c0_45 = arith.constant 0 : index
      %c0_46 = arith.constant 0 : index
      %79 = vector.load %arg3[%c0_44, %c0_45, %c0_46] : memref<1x8x32xf32, #tpu.memory_space<vmem>>, vector<1x8x32xf32>
      %80 = vector.shape_cast %79 : vector<1x8x32xf32> to vector<8x32xf32>
      %c0_47 = arith.constant 0 : index
      %c0_48 = arith.constant 0 : index
      %81 = vector.load %arg8[%c0_47, %c0_48] : memref<8x32xf32, #tpu.memory_space<vmem>>, vector<8x32xf32>
      tpu.vector_store %arg8[%c0_47, %c0_48], %80 {strides = array<i32>} : memref<8x32xf32, #tpu.memory_space<vmem>>, vector<8x32xf32>,
      %c0_49 = arith.constant 0 : index
      %c0_50 = arith.constant 0 : index
      %c0_51 = arith.constant 0 : index
      %82 = vector.load %arg4[%c0_49, %c0_50, %c0_51] : memref<1x8x32xf32, #tpu.memory_space<vmem>>, vector<1x8x32xf32>
      %83 = vector.shape_cast %82 : vector<1x8x32xf32> to vector<8x32xf32>
      %c0_52 = arith.constant 0 : index
      %c0_53 = arith.constant 0 : index
      %84 = vector.load %arg9[%c0_52, %c0_53] : memref<8x32xf32, #tpu.memory_space<vmem>>, vector<8x32xf32>
      tpu.vector_store %arg9[%c0_52, %c0_53], %83 {strides = array<i32>} : memref<8x32xf32, #tpu.memory_space<vmem>>, vector<8x32xf32>,
      %85 = vector.shape_cast %4 : vector<8x1xf32> to vector<1x8x1xf32>
      %cst_54 = arith.constant dense<0.000000e+00> : vector<1xf32>
      %86 = vector.multi_reduction <add>, %85, %cst_54 [1, 2] : vector<1x8x1xf32> to vector<1xf32>
      %87 = vector.shape_cast %86 : vector<1xf32> to vector<1x1x1xf32>
      %88 = vector.extract %87[0, 0, 0] : f32 from vector<1x1x1xf32>
      %cst_55 = arith.constant 8.000000e+00 : f32
      %89 = arith.divf %88, %cst_55 : f32
      %90 = vector.broadcast %89 : f32 to vector<8x1xf32>
      %91 = arith.subf %4, %90 : vector<8x1xf32>
      %92 = arith.mulf %91, %91 : vector<8x1xf32>
      %93 = vector.shape_cast %92 : vector<8x1xf32> to vector<1x8x1xf32>
      %cst_56 = arith.constant dense<0.000000e+00> : vector<1xf32>
      %94 = vector.multi_reduction <add>, %93, %cst_56 [1, 2] : vector<1x8x1xf32> to vector<1xf32>
      %95 = vector.shape_cast %94 : vector<1xf32> to vector<1x1x1xf32>
      %96 = vector.extract %95[0, 0, 0] : f32 from vector<1x1x1xf32>
      %cst_57 = arith.constant 7.000000e+00 : f32
      %97 = arith.divf %96, %cst_57 : f32
      %98 = vector.broadcast %89 : f32 to vector<8x1xf32>
      %c0_58 = arith.constant 0 : index
      %c0_59 = arith.constant 0 : index
      %99 = vector.load %arg10[%c0_58, %c0_59] : memref<8x1xf32, #tpu.memory_space<vmem>>, vector<8x1xf32>
      tpu.vector_store %arg10[%c0_58, %c0_59], %98 {strides = array<i32>} : memref<8x1xf32, #tpu.memory_space<vmem>>, vector<8x1xf32>,
      %100 = math.sqrt %97 : f32
      %cst_60 = arith.constant 1.000000e+00 : f32
      %101 = arith.divf %cst_60, %100 : f32
      %102 = vector.broadcast %101 : f32 to vector<8x1xf32>
      %c0_61 = arith.constant 0 : index
      %c0_62 = arith.constant 0 : index
      %103 = vector.load %arg11[%c0_61, %c0_62] : memref<8x1xf32, #tpu.memory_space<vmem>>, vector<8x1xf32>
      tpu.vector_store %arg11[%c0_61, %c0_62], %102 {strides = array<i32>} : memref<8x1xf32, #tpu.memory_space<vmem>>, vector<8x1xf32>,
    } else {
    }
    %c0_4 = arith.constant 0 : index
    %c0_5 = arith.constant 0 : index
    %8 = vector.load %arg10[%c0_4, %c0_5] : memref<8x1xf32, #tpu.memory_space<vmem>>, vector<8x1xf32>
    %9 = arith.subf %4, %8 : vector<8x1xf32>
    %c0_6 = arith.constant 0 : index
    %c0_7 = arith.constant 0 : index
    %10 = vector.load %arg11[%c0_6, %c0_7] : memref<8x1xf32, #tpu.memory_space<vmem>>, vector<8x1xf32>
    %11 = arith.mulf %9, %10 : vector<8x1xf32>
    %c0_8 = arith.constant 0 : index
    %c0_9 = arith.constant 0 : index
    %12 = vector.load %arg8[%c0_8, %c0_9] : memref<8x32xf32, #tpu.memory_space<vmem>>, vector<8x32xf32>
    %c0_10 = arith.constant 0 : index
    %c0_11 = arith.constant 0 : index
    %13 = vector.load %arg9[%c0_10, %c0_11] : memref<8x32xf32, #tpu.memory_space<vmem>>, vector<8x32xf32>
    %c0_12 = arith.constant 0 : index
    %c0_13 = arith.constant 0 : index
    %14 = vector.load %arg5[%c0_12, %c0_13] : memref<8x128xf32, #tpu.memory_space<vmem>>, vector<1x128xf32>
    %c1 = arith.constant 1 : index
    %c0_14 = arith.constant 0 : index
    %15 = vector.load %arg5[%c1, %c0_14] : memref<8x128xf32, #tpu.memory_space<vmem>>, vector<1x128xf32>
    %c2 = arith.constant 2 : index
    %c0_15 = arith.constant 0 : index
    %16 = vector.load %arg5[%c2, %c0_15] : memref<8x128xf32, #tpu.memory_space<vmem>>, vector<1x32xf32>
    %c3 = arith.constant 3 : index
    %c0_16 = arith.constant 0 : index
    %17 = vector.load %arg5[%c3, %c0_16] : memref<8x128xf32, #tpu.memory_space<vmem>>, vector<1x2xf32>
    %c4 = arith.constant 4 : index
    %c0_17 = arith.constant 0 : index
    %18 = vector.load %arg5[%c4, %c0_17] : memref<8x128xf32, #tpu.memory_space<vmem>>, vector<1x32xf32>
    %c5 = arith.constant 5 : index
    %c0_18 = arith.constant 0 : index
    %19 = vector.load %arg5[%c5, %c0_18] : memref<8x128xf32, #tpu.memory_space<vmem>>, vector<1x32xf32>
    %c0_19 = arith.constant 0 : index
    %c0_20 = arith.constant 0 : index
    %20 = vector.load %arg6[%c0_19, %c0_20] : memref<32x160xf32, #tpu.memory_space<vmem>>, vector<32x128xf32>
    %c0_21 = arith.constant 0 : index
    %c128 = arith.constant 128 : index
    %21 = vector.load %arg6[%c0_21, %c128] : memref<32x160xf32, #tpu.memory_space<vmem>>, vector<32x32xf32>
    %22 = vector.broadcast %11 : vector<8x1xf32> to vector<8x128xf32>
    %23 = vector.broadcast %14 : vector<1x128xf32> to vector<8x128xf32>
    %24 = arith.mulf %22, %23 : vector<8x128xf32>
    %cst_22 = arith.constant dense<0.000000e+00> : vector<8x128xf32>
    %25 = tpu.matmul %12, %20, %cst_22 {dimension_numbers = #tpu.dot_dimension_numbers<[1], [0], [0], [1], [0, 0, 1, 1], [], []>} : vector<8x32xf32>, vector<32x128xf32>, vector<8x128xf32> -> vector<8x128xf32>
    %26 = arith.addf %24, %25 : vector<8x128xf32>
    %27 = vector.broadcast %15 : vector<1x128xf32> to vector<8x128xf32>
    %28 = arith.addf %26, %27 : vector<8x128xf32>
    %29 = vector.extract_strided_slice %28 {offsets = [0, 0], sizes = [8, 96], strides = [1, 1]} : vector<8x128xf32> to vector<8x96xf32>
    %30 = arith.negf %29 : vector<8x96xf32>
    %31 = math.exp %30 : vector<8x96xf32>
    %cst_23 = arith.constant 1.000000e+00 : f32
    %32 = vector.broadcast %cst_23 : f32 to vector<8x96xf32>
    %33 = arith.addf %32, %31 : vector<8x96xf32>
    %34 = arith.divf %32, %33 : vector<8x96xf32>
    %35 = vector.extract_strided_slice %28 {offsets = [0, 96], sizes = [8, 32], strides = [1, 1]} : vector<8x128xf32> to vector<8x32xf32>
    %36 = math.tanh %35 : vector<8x32xf32>
    %37 = vector.extract_strided_slice %34 {offsets = [0, 0], sizes = [8, 32], strides = [1, 1]} : vector<8x96xf32> to vector<8x32xf32>
    %38 = vector.extract_strided_slice %34 {offsets = [0, 32], sizes = [8, 32], strides = [1, 1]} : vector<8x96xf32> to vector<8x32xf32>
    %39 = vector.extract_strided_slice %34 {offsets = [0, 64], sizes = [8, 32], strides = [1, 1]} : vector<8x96xf32> to vector<8x32xf32>
    %40 = arith.mulf %38, %13 : vector<8x32xf32>
    %41 = arith.mulf %37, %36 : vector<8x32xf32>
    %42 = arith.addf %40, %41 : vector<8x32xf32>
    %43 = math.tanh %42 : vector<8x32xf32>
    %44 = arith.mulf %39, %43 : vector<8x32xf32>
    %cst_24 = arith.constant dense<0.000000e+00> : vector<8x32xf32>
    %45 = tpu.matmul %42, %21, %cst_24 {dimension_numbers = #tpu.dot_dimension_numbers<[1], [0], [0], [1], [0, 0, 1, 1], [], []>} : vector<8x32xf32>, vector<32x32xf32>, vector<8x32xf32> -> vector<8x32xf32>
    %46 = vector.broadcast %16 : vector<1x32xf32> to vector<8x32xf32>
    %47 = arith.addf %45, %46 : vector<8x32xf32>
    %cst_25 = arith.constant 0.000000e+00 : f32
    %48 = vector.broadcast %cst_25 : f32 to vector<8x32xf32>
    %49 = arith.maximumf %47, %48 : vector<8x32xf32>
    %50 = vector.broadcast %18 : vector<1x32xf32> to vector<8x32xf32>
    %51 = arith.mulf %49, %50 : vector<8x32xf32>
    %cst_26 = arith.constant dense<0.000000e+00> : vector<8xf32>
    %52 = vector.multi_reduction <add>, %51, %cst_26 [1] : vector<8x32xf32> to vector<8xf32>
    %53 = vector.shape_cast %52 : vector<8xf32> to vector<8x1xf32>
    %54 = vector.broadcast %19 : vector<1x32xf32> to vector<8x32xf32>
    %55 = arith.mulf %49, %54 : vector<8x32xf32>
    %cst_27 = arith.constant dense<0.000000e+00> : vector<8xf32>
    %56 = vector.multi_reduction <add>, %55, %cst_27 [1] : vector<8x32xf32> to vector<8xf32>
    %57 = vector.shape_cast %56 : vector<8xf32> to vector<8x1xf32>
    %58 = tpu.concatenate %53, %57 in 1 : vector<8x1xf32>, vector<8x1xf32> -> vector<8x2xf32>
    %59 = vector.broadcast %17 : vector<1x2xf32> to vector<8x2xf32>
    %60 = arith.addf %58, %59 : vector<8x2xf32>
    %cst_28 = arith.constant 2.000000e+01 : f32
    %61 = vector.broadcast %cst_28 : f32 to vector<8x2xf32>
    %62 = arith.cmpf ogt, %60, %61 : vector<8x2xf32>
    %cst_29 = arith.constant 2.000000e+01 : f32
    %63 = vector.broadcast %cst_29 : f32 to vector<8x2xf32>
    %64 = arith.minimumf %60, %63 : vector<8x2xf32>
    %65 = math.exp %64 : vector<8x2xf32>
    %66 = math.log1p %65 : vector<8x2xf32>
    %67 = arith.select %62, %60, %66 : vector<8x2xi1>, vector<8x2xf32>
    %c0_30 = arith.constant 0 : index
    %c0_31 = arith.constant 0 : index
    %68 = vector.load %arg8[%c0_30, %c0_31] : memref<8x32xf32, #tpu.memory_space<vmem>>, vector<8x32xf32>
    tpu.vector_store %arg8[%c0_30, %c0_31], %44 {strides = array<i32>} : memref<8x32xf32, #tpu.memory_space<vmem>>, vector<8x32xf32>,
    %c0_32 = arith.constant 0 : index
    %c0_33 = arith.constant 0 : index
    %69 = vector.load %arg9[%c0_32, %c0_33] : memref<8x32xf32, #tpu.memory_space<vmem>>, vector<8x32xf32>
    tpu.vector_store %arg9[%c0_32, %c0_33], %42 {strides = array<i32>} : memref<8x32xf32, #tpu.memory_space<vmem>>, vector<8x32xf32>,
    %c0_34 = arith.constant 0 : index
    %c0_35 = arith.constant 0 : index
    %c0_36 = arith.constant 0 : index
    %c0_37 = arith.constant 0 : index
    %70 = vector.load %arg7[%c0_34, %c0_35, %c0_36, %c0_37] : memref<1x1x8x128xf32, #tpu.memory_space<vmem>>, vector<1x1x8x32xf32>
    %71 = vector.shape_cast %70 : vector<1x1x8x32xf32> to vector<8x32xf32>
    %72 = vector.shape_cast %44 : vector<8x32xf32> to vector<1x1x8x32xf32>
    tpu.vector_store %arg7[%c0_34, %c0_35, %c0_36, %c0_37], %72 {strides = array<i32>} : memref<1x1x8x128xf32, #tpu.memory_space<vmem>>, vector<1x1x8x32xf32>,
    %c0_38 = arith.constant 0 : index
    %c0_39 = arith.constant 0 : index
    %c0_40 = arith.constant 0 : index
    %c32 = arith.constant 32 : index
    %73 = vector.load %arg7[%c0_38, %c0_39, %c0_40, %c32] : memref<1x1x8x128xf32, #tpu.memory_space<vmem>>, vector<1x1x8x32xf32>
    %74 = vector.shape_cast %73 : vector<1x1x8x32xf32> to vector<8x32xf32>
    %75 = vector.shape_cast %42 : vector<8x32xf32> to vector<1x1x8x32xf32>
    tpu.vector_store %arg7[%c0_38, %c0_39, %c0_40, %c32], %75 {strides = array<i32>} : memref<1x1x8x128xf32, #tpu.memory_space<vmem>>, vector<1x1x8x32xf32>,
    %c0_41 = arith.constant 0 : index
    %c0_42 = arith.constant 0 : index
    %c0_43 = arith.constant 0 : index
    %c64 = arith.constant 64 : index
    %76 = vector.load %arg7[%c0_41, %c0_42, %c0_43, %c64] : memref<1x1x8x128xf32, #tpu.memory_space<vmem>>, vector<1x1x8x2xf32>
    %77 = vector.shape_cast %76 : vector<1x1x8x2xf32> to vector<8x2xf32>
    %78 = vector.shape_cast %67 : vector<8x2xf32> to vector<1x1x8x2xf32>
    tpu.vector_store %arg7[%c0_41, %c0_42, %c0_43, %c64], %78 {strides = array<i32>} : memref<1x1x8x128xf32, #tpu.memory_space<vmem>>, vector<1x1x8x2xf32>,
    return
  }
  func.func @transform_0(%arg0: i32, %arg1: i32) -> (i32, i32, i32, i32) {
    %c0_i32 = arith.constant 0 : i32
    %c0_i32_0 = arith.constant 0 : i32
    %c0_i32_1 = arith.constant 0 : i32
    return %arg0, %arg1, %c0_i32, %c0_i32_0 : i32, i32, i32, i32
  }
  func.func @transform_1(%arg0: i32, %arg1: i32) -> (i32, i32, i32) {
    %c0_i32 = arith.constant 0 : i32
    %c0_i32_0 = arith.constant 0 : i32
    %c0_i32_1 = arith.constant 0 : i32
    return %arg0, %c0_i32, %c0_i32_0 : i32, i32, i32
  }
  func.func @transform_2(%arg0: i32, %arg1: i32) -> (i32, i32, i32) {
    %c0_i32 = arith.constant 0 : i32
    %c0_i32_0 = arith.constant 0 : i32
    %c0_i32_1 = arith.constant 0 : i32
    return %arg0, %c0_i32, %c0_i32_0 : i32, i32, i32
  }
  func.func @transform_3(%arg0: i32, %arg1: i32) -> (i32, i32) {
    %c0_i32 = arith.constant 0 : i32
    %c0_i32_0 = arith.constant 0 : i32
    %c0_i32_1 = arith.constant 0 : i32
    return %c0_i32, %c0_i32_0 : i32, i32
  }
  func.func @transform_4(%arg0: i32, %arg1: i32) -> (i32, i32) {
    %c0_i32 = arith.constant 0 : i32
    %c0_i32_0 = arith.constant 0 : i32
    %c0_i32_1 = arith.constant 0 : i32
    return %c0_i32, %c0_i32_0 : i32, i32
  }
  func.func @transform_5(%arg0: i32, %arg1: i32) -> (i32, i32, i32, i32) {
    %c0_i32 = arith.constant 0 : i32
    %c0_i32_0 = arith.constant 0 : i32
    %c0_i32_1 = arith.constant 0 : i32
    return %arg0, %arg1, %c0_i32, %c0_i32_0 : i32, i32, i32, i32
  }
}

</mosaic_0001>

<bundles_post_ra>
// kernel: norm_lstmc_rollout.1
= control target key start
LH: loop header
LB: loop body
LE: loop exit
PB: predicated region body
PF: predicated region fallthrough
CT: control target
= control target key end

     0   :  { %s1655_s0 = inlined_call_operand.hbm [shape: f32[2,8,8,16], index: 0, kind: input, shape index: {}]   ;;  %s1656_s1 = inlined_call_operand.hbm [shape: f32[2,8,32], index: 1, kind: input, shape index: {}]   ;;  %s1657_s2 = inlined_call_operand.hbm [shape: f32[2,8,32], index: 2, kind: input, shape index: {}]   ;;  %s1658_s3 = inlined_call_operand.hbm [shape: f32[8,128], index: 3, kind: input, shape index: {}]   ;;  %s1659_s4 = inlined_call_operand.hbm [shape: f32[32,160], index: 4, kind: input, shape index: {}]   ;;  %s1660_s5 = inlined_call_operand.vmem [shape: f32[2,8,8,128], index: 5, kind: output, shape index: {}]  }
   0x1   :  { %1680 = sst [smem:[#allocation24_spill]] %s1656_s1 }
   0x2   :  { %1681 = sst [smem:[#allocation25_spill]] %s1658_s3 }
   0x3   :  { %1682 = sst [smem:[#allocation26_spill]] %s1659_s4 }
   0x4   :  { %1683 = sst [smem:[#allocation27_spill]] %s1660_s5 }
   0x5   :  { %10 = vsyncpa [#allocation7], 0 }
   0x6   :  { %12 = vsyncpa [#allocation7 + $0x1], 0 }
   0x7   :  { %13 = vsyncpa [#allocation9], 0 }
   0x8   :  { %15 = vsyncpa [#allocation9 + $0x1], 0 }
   0x9   :  { %16 = vsyncpa [#allocation12], 0  ;;  %s1354_s18 = smov 0   ;;  %s1356_s19 = smov 0  }
   0xa   :  { %s1358_s20 = smov 0   ;;  %s1360_s21 = smov 0  }
   0xb   :  { %s1362_s22 = smov 0   ;;  %s1364_s23 = smov 0  }
   0xc   :  { %s1366_s24 = smov 0   ;;  %s1368_s25 = smov 0  }
   0xd   :  { %s1370_s26 = smov 0   ;;  %s1372_s27 = smov 0  }
   0xe   :  { %s1374_s28 = smov 0  }
   0xf LB: > { %1684 = sst [smem:[#allocation17_spill]] %s1273_s19  ;;  %s1661_s29 = sadd.s32 4294967295, %s1309_s28   ;;  %s1309_s28 = sphi %s1374_s28, %s22_s28   ;;  %s1305_s27 = sphi %s1372_s27, %s1729_s27   ;;  %s1301_s26 = sphi %s1370_s26, %s1728_s26   ;;  %s1297_s25 = sphi %s1368_s25, %s1727_s25   ;;  %s1293_s24 = sphi %s1366_s24, %s1726_s24   ;;  %s1289_s23 = sphi %s1364_s23, %s1725_s23   ;;  %s1285_s22 = sphi %s1362_s22, %s1724_s22   ;;  %s1281_s21 = sphi %s1360_s21, %s1723_s21   ;;  %s1277_s20 = sphi %s1358_s20, %s1722_s20   ;;  %s1273_s19 = sphi %s1356_s19, %s1721_s19   ;;  %s1269_s18 = sphi %s1354_s18, %s1719_s18  }
  0x10   : > { %1685 = sst [smem:[#allocation18_spill]] %s1293_s24  ;;  %p853_p0 = scmp.ge.s32.totalorder %s1309_s28, 1 }
  0x11   : > { %1686 = sst [smem:[#allocation19_spill]] %s1297_s25  ;;  %p1413_p1 = scmp.eq.s32.totalorder %s1661_s29, 0 }
  0x12   : > { %p189_p2 = scmp.lt.s32.totalorder %s1309_s28, 17  ;;  %s1311_s7 = smov [#allocation11]  }
  0x13   : > { %s1687_s30 = scalar_select %p1413_p1, 1, 0 }
  0x14   : > { %p1418_p3 = pnand %p853_p0, %p189_p2  ;;  %s202_s8 = sshll.u32 %s1311_s7, 4  ;;  %s203_s8 = int_to_ptr.vmem [resolvable:$true] %s202_s8 }
  0x15   : > { %1688 = sst [smem:[#allocation20_spill]] %s1687_s30  ;;  %s1086_s10 = scalar_lea.vmem %s203_s8, 128 }
  0x16   : > { %s1689_s6 = scalar_select %p1418_p3, 1, 0 }
  0x17   : > { %p938_p4 = pneg %p1418_p3  ;;  %p1087_p7 = scmp.ne.s32.totalorder %s203_s8, %s1086_s10 }
  0x18   : > { %p1094_p10 = scmp.lt.s32.totalorder %s203_s8, %s203_s8  ;;  %p1095_p11 = scmp.lt.s32.totalorder %s1086_s10, %s1086_s10 }
  0x19   : > { %p1426_p5 = pnand %p938_p4, %p1413_p1 }
  0x1a   : > { %p1096_p12 = por %p1095_p11, %p1094_p10 }
  0x1b   : > { %p1077_p6 = pneg %p1426_p5 }
  0x1d   : > { %p1089_p8 = pnand %p1087_p7, %p1077_p6 }
  0x1f   : > { %p1090_p9 = pneg %p1089_p8 }
  0x21   : > { %p1097_p13 = pnand %p1096_p12, %p1090_p9 }
  0x23   : > { %1100 = shalt.err (!%p1097_p13)
}
  0x24   : > { %s1691_s3 = sld [smem:[#allocation25_spill]]  ;;  %p1664_p0 = scmp.eq.s32.totalorder %s1309_s28, 0 }
  0x25   : > { %p76_p2 = scmp.ne.s32.totalorder %s1277_s20, %s1273_s19  ;;  %p82_p4 = scmp.ne.s32.totalorder %s1273_s19, %s1269_s18 }
  0x26   : > { %p1663_p7 = scmp.lt.s32.totalorder %s1309_s28, 16  ;;  %s246_s13 = sand.u32 1, %s1309_s28  }
  0x27   : > { %p78_p8 = por %p76_p2, %p1664_p0  ;;  %p1451_p9 = por %p82_p4, %p1413_p1 }
  0x28   : > { %s248_s15 = sand.u32 1, %s1277_s20   ;;  %s1662_s16 = sshll.u32 %s1305_s27, 7 }
  0x29   : > { %s1692_s14 = scalar_select %p1451_p9, 1, 0 }
  0x2a   : > { %941 = dma.hbm_to_vmem [thread:$0]  (!%p1426_p5), %s1691_s3, 128, %s203_s8, [#allocation12]  }
  0x2b   : > { %1693 = sst [smem:[#allocation21_spill]] %s1692_s14  ;;  %s1457_s17 = sshll.u32 %s248_s15, 3 }
  0x2c   : > { %s1694_s1 = sld [smem:[#allocation24_spill]]  ;;  %p1466_p10 = pnand %p1663_p7, %p78_p8 }
  0x2d   : > { %s250_s12 = scalar_lea.vmem [#allocation8], %s1457_s17  ;;  %s1472_s3 = scalar_lea.sflag [#allocation9], %s246_s13 }
  0x2e   : > { %s257_s29 = sshll.u32 %s250_s12, 4  ;;  %p1665_p11 = pneg %p1466_p10  ;;  %s258_s29 = int_to_ptr.vmem [resolvable:$true] %s257_s29 }
  0x2f   : > { %s1114_s15 = scalar_lea.vmem %s258_s29, 128  ;;  %s1312_s7 = smov [#allocation8]  }
  0x30   : > { %p1115_p12 = scmp.ne.s32.totalorder %s258_s29, %s1114_s15  ;;  %s1119_s10 = sshll.u32 %s1312_s7, 4  ;;  %s1120_s10 = int_to_ptr.vmem [resolvable:$false] %s1119_s10 }
  0x31   : > { %p1122_p4 = scmp.lt.s32.totalorder %s258_s29, %s1120_s10 }
  0x32   : > { %s255_s8 = scalar_lea.hbm %s1694_s1, %s1662_s16  ;;  %p1117_p13 = pnand %p1115_p12, %p1665_p11 }
  0x33   : > { %s1121_s16 = scalar_lea.vmem %s1120_s10, 256 }
  0x34   : > { %p1118_p2 = pneg %p1117_p13  ;;  %p1123_p8 = scmp.lt.s32.totalorder %s1121_s16, %s1114_s15 }
  0x36   : > { %p1124_p7 = por %p1123_p8, %p1122_p4 }
  0x38   : > { %p1125_p0 = pnand %p1124_p7, %p1118_p2 }
  0x3a   : > { %1128 = shalt.err (!%p1125_p0)
}
  0x3b   : > { %951 = dma.hbm_to_vmem [thread:$0]  (!%p1466_p10), %s255_s8, 128, %s258_s29, %s1472_s3  }
  0x3c   : > { %s1313_s13 = smov [#allocation13]  }
  0x3d   : > { %s212_s12 = sshll.u32 %s1313_s13, 4  ;;  %s213_s12 = int_to_ptr.vmem [resolvable:$true] %s212_s12 }
  0x3e   : > { %s1140_s11 = scalar_lea.vmem %s213_s12, 1024  ;;  %p1148_p9 = scmp.lt.s32.totalorder %s213_s12, %s213_s12 }
  0x3f   : > { %p1141_p12 = scmp.ne.s32.totalorder %s213_s12, %s1140_s11  ;;  %p1149_p3 = scmp.lt.s32.totalorder %s1140_s11, %s1140_s11 }
  0x41   : > { %p1143_p13 = pnand %p1141_p12, %p1077_p6  ;;  %p1150_p1 = por %p1149_p3, %p1148_p9 }
  0x43   : > { %p1144_p11 = pneg %p1143_p13 }
  0x45   : > { %p1151_p4 = pnand %p1150_p1, %p1144_p11 }
  0x47   : > { %1154 = shalt.err (!%p1151_p4)
}
  0x48   : > { %s1314_s16 = smov 256   ;;  %s1315_s29 = smov 16  }
  0x49   : > { %s1696_s4 = sld [smem:[#allocation26_spill]]  ;;  %s31_s15 = sadd.s32 1, %s1301_s26 }
  0x4a   : > { %s34_s7 = sadd.s32 1, %s1305_s27  ;;  %p32_p1 = scmp.ge.s32.totalorder %s31_s15, 8 }
  0x4b   : > { %s43_s10 = sadd.s32 1, %s1289_s23  ;;  %p50_p3 = scmp.ne.s32.totalorder %s1289_s23, %s1285_s22 }
  0x4c   : > { %p56_p6 = scmp.ne.s32.totalorder %s1285_s22, %s1281_s21  ;;  %s1731_s15 = smov (%p32_p1, %s31_s15), 0 }
  0x4d   : > { %1697 = sst [smem:[#allocation22_spill]] %s1731_s15  ;;  %s1733_s7 = smov (!%p32_p1, %s34_s7), %s1305_s27 }
  0x4e   : > { %s39_s9 = ssub.s32 %s1301_s26, %s1731_s15  ;;  %p1698_p0 = scmp.eq.s32.totalorder %s1309_s28, 0 }
  0x4f   : > { %944 = dma.hbm_to_vmem [thread:$0]  (!%p1426_p5), %s1696_s4, 1024, %s213_s12, [#allocation12], %s1314_s16, %s1314_s16, %s1315_s29  }
  0x50   : > { %p1504_p7 = por %p1698_p0, %p50_p3  ;;  %p36_p5 = scmp.ge.s32.totalorder %s1733_s7, 2 }
  0x51   : > { %p1700_p9 = scmp.ne.s32.totalorder %s1687_s30, 0  ;;  %s226_s21 = sand.u32 1, %s1289_s23  }
  0x52   : > { %s858_s16 = sshll.u32 %s1305_s27, 3  ;;  %s1735_s7 = smov (%p36_p5, %s1733_s7), 0 }
  0x53   : > { %p1510_p11 = por %p1700_p9, %p56_p6  ;;  %s857_s29 = sshll.u32 %s226_s21, 3 }
  0x54   : > { %s38_s8 = ssub.s32 %s1305_s27, %s1735_s7  ;;  %s235_s1 = sadd.s32 %s1301_s26, %s858_s16 }
  0x55   : > { %s1701_s12 = scalar_select %p1510_p11, 1, 0 }
  0x56   : > { %s40_s11 = sor.u32 %s39_s9, %s38_s8  ;;  %p67_p2 = scmp.eq.s32.totalorder %s38_s8, 0 }
  0x57   : > { %1702 = sst [smem:[#allocation23_spill]] %s1701_s12  ;;  %p41_p8 = scmp.eq.s32.totalorder %s40_s11, 0 }
  0x58   : > { %s1703_s4 = sadd.s32 1, %s1277_s20  ;;  %s859_s24 = sshll.u32 %s235_s1, 7 }
  0x59   : > { %s1524_s15 = scalar_select %p67_p2, %s1277_s20, %s1703_s4  }
  0x5a   : > { %s1527_s5 = scalar_select %p41_p8, %s1289_s23, %s43_s10  }
  0x5b   : > { %s230_s25 = scalar_lea.vmem [#allocation6], %s857_s29  ;;  %s237_s12 = scalar_lea.hbm %s1655_s0, %s859_s24 }
  0x5c   : > { %s239_s30 = sshll.u32 %s230_s25, 4  ;;  %p1704_p12 = scmp.lt.s32.totalorder %s1309_s28, 16  ;;  %s240_s30 = int_to_ptr.vmem [resolvable:$true] %s239_s30 }
  0x5d   : > { %s268_s16 = scalar_lea.vmem [#allocation10], %s1457_s17  ;;  %s1706_s8 = sshll.u32 %s1305_s27, 7 }
  0x5e   : > { %p1536_p13 = pnand %p1704_p12, %p1504_p7  ;;  %s275_s4 = sshll.u32 %s268_s16, 4  ;;  %s1548_s4 = int_to_ptr.vmem [resolvable:$true] %s275_s4 }
  0x5f   : > { %s1546_s1 = scalar_lea.hbm %s1657_s2, %s1706_s8  ;;  %s227_s19 = scalar_lea.sflag [#allocation7], %s226_s21 }
  0x60   : > { %p1157_p4 = pneg %p1536_p13  ;;  %s1168_s24 = scalar_lea.vmem %s240_s30, 128 }
  0x61   : > { %p1169_p1 = scmp.ne.s32.totalorder %s240_s30, %s1168_s24  ;;  %s1316_s25 = smov [#allocation6]  }
  0x62   : > { %s1173_s14 = sshll.u32 %s1316_s25, 4  ;;  %s1174_s14 = int_to_ptr.vmem [resolvable:$false] %s1173_s14 }
  0x63   : > { %p1171_p3 = pnand %p1169_p1, %p1157_p4  ;;  %s1175_s17 = scalar_lea.vmem %s1174_s14, 256 }
  0x64   : > { %p1176_p0 = scmp.lt.s32.totalorder %s240_s30, %s1174_s14  ;;  %p1177_p7 = scmp.lt.s32.totalorder %s1175_s17, %s1168_s24 }
  0x65   : > { %p1172_p6 = pneg %p1171_p3 }
  0x66   : > { %p1178_p5 = por %p1177_p7, %p1176_p0 }
  0x68   : > { %p1179_p9 = pnand %p1178_p5, %p1172_p6 }
  0x6a   : > { %1182 = shalt.err (!%p1179_p9)
}
  0x6b   : > { %948 = dma.hbm_to_vmem [thread:$0]  (!%p1536_p13), %s237_s12, 128, %s240_s30, %s227_s19  }
  0x6c   : > { %s1196_s13 = scalar_lea.vmem %s1548_s4, 128  ;;  %p1707_p8 = pneg %p1466_p10 }
  0x6d   : > { %p1197_p2 = scmp.ne.s32.totalorder %s1548_s4, %s1196_s13  ;;  %s1317_s21 = smov [#allocation10]  }
  0x6e   : > { %s1201_s29 = sshll.u32 %s1317_s21, 4  ;;  %s1202_s29 = int_to_ptr.vmem [resolvable:$false] %s1201_s29 }
  0x6f   : > { %p1199_p12 = pnand %p1197_p2, %p1707_p8  ;;  %s1203_s16 = scalar_lea.vmem %s1202_s29, 256 }
  0x70   : > { %p1204_p1 = scmp.lt.s32.totalorder %s1548_s4, %s1202_s29  ;;  %p1205_p3 = scmp.lt.s32.totalorder %s1203_s16, %s1196_s13 }
  0x71   : > { %p1200_p4 = pneg %p1199_p12 }
  0x72   : > { %p1206_p6 = por %p1205_p3, %p1204_p1 }
  0x74   : > { %p1207_p0 = pnand %p1206_p6, %p1200_p4 }
  0x76   : > { %1210 = shalt.err (!%p1207_p0)
}
  0x77   : > { %954 = dma.hbm_to_vmem [thread:$0]  (!%p1466_p10), %s1546_s1, 128, %s1548_s4, %s1472_s3  }
  0x78   : > { %p1708_p13 = scmp.ne.s32.totalorder %s1689_s6, 0 }
  0x79   : > { %s286_s12 = sand.u32 (!%p1708_p13), 1, %s1285_s22  }
  0x7a   : > { %284 = sbr.rel (%p1708_p13) target bundleno = 1901 (0x76d), region = 40  ;;  %s865_s9 = sshll.u32 (!%p1708_p13), %s286_s12, 3 }
  0x7b   : > { %s287_s8 = scalar_lea.sflag (!%p1708_p13), [#allocation7], %s286_s12  ;;  %s290_s10 = scalar_lea.vmem (!%p1708_p13), [#allocation6], %s865_s9 }
  0x7f   : > { %1256 = dma.done.wait (%p1510_p11), %s287_s8, 128  }
  0x80   : > { %1258 = vsyncadd (%p1510_p11), %s287_s8, 4294967168  ;;  %s1710_s18 = sadd.s32 4294967295, %s1309_s28   ;;  %s1711_s11 = sld [smem:[#allocation17_spill]] }
  0x81   : > { %s1712_s19 = sld [smem:[#allocation21_spill]]  ;;  %s295_s24 = sand.u32 1, %s1710_s18  }
  0x82   : > { %s296_s6 = scalar_lea.sflag [#allocation9], %s295_s24 }
  0x86   : > { %s297_s3 = sand.u32 1, %s1711_s11  }
  0x87   : > { %s1575_s4 = sshll.u32 %s297_s3, 3  ;;  %p1713_p10 = scmp.ne.s32.totalorder %s1712_s19, 0 }
  0x88   : > { %s299_s1 = scalar_lea.vmem [#allocation8], %s1575_s4 }
  0x89   : > { %1260 = dma.done.wait (%p1713_p10), %s296_s6, 256  }
  0x8a   : > { %1262 = vsyncadd (%p1713_p10), %s296_s6, 4294967040  ;;  %s1714_s25 = sld [smem:[#allocation20_spill]]  ;;  %s308_s14 = scalar_lea.vmem [#allocation10], %s1575_s4 }
  0x90   : > { %p1715_p11 = scmp.ne.s32.totalorder %s1714_s25, 0 }
  0x92   : > { %1264 = dma.done.wait (%p1715_p11), [#allocation12], 1152  }
  0x93   : > { %1266 = vsyncadd (%p1715_p11), [#allocation12], 4294966144  ;;  %s1716_s17 = sld [smem:[#allocation19_spill]]  ;;  %v364_v0 = vld [vmem:[%s290_s10] sm:$0xff]  ;;  %vm366_vm0 = vcmask 130048  }
  0x94   : > { %s1717_s13 = sld [smem:[#allocation18_spill]]  ;;  %v365_v1 = vand.u32 2147483647, %v364_v0 }
  0x95   : > { %s1718_s8 = sld [smem:[#allocation27_spill]] }
  0x96   : > { %v367_v2 = vsel %vm366_vm0, %v365_v1, 0.0 }
  0x97   : > { %368 = vadd.xlane.f32.xlu0 %v367_v2 }
  0x99   : > { %p356_p7 = scmp.lt.s32.totalorder %s1716_s17, 1 }
  0x9a   : > { %p358_p5 = scmp.lt.s32.totalorder %s1717_s13, 7  ;;  %p872_p9 = scmp.ne.s32.totalorder %s1717_s13, 0 }
  0x9b   : > { %s1737_s17 = smov (!%p356_p7, %s1716_s17), 1 }
  0x9c   : > { %s359_s21 = scalar_select %p358_p5, %s1717_s13, 7 }
  0x9d   : > { %s870_s29 = sshll.u32 %s1737_s17, 3 }
  0x9e   : > { %s361_s16 = sadd.s32 %s870_s29, %s359_s21 }
  0x9f   : > { %s871_s30 = sshll.u32 %s361_s16, 3 }
  0xa0   : > { %s1594_s18 = scalar_lea.vmem %s1718_s8, %s871_s30 }
 0x11c   : > { %373 = sbr.rel (%p872_p9) target bundleno = 837 (0x345), region = 64 }
 0x120   : > { %v1596_v3 = vpop.xlane.xlu0 %368 }
 0x121   : > { %vm379_vm1 = vcmask 7168   ;;  %v374_v5 = vld [vmem:[%s299_s1] sm:$0xff]  ;;  %vm375_vm2 = vcmask 261120   ;;  %v377_v6 = vld [vmem:[%s308_s14] sm:$0xff] }
 0x122   : > { %v380_v4 = vsel %vm379_vm1, %v1596_v3, 0.0  ;;  %376 = vst.msk [vmem:[#allocation2] sm:$0xff] %vm375_vm2, %v374_v5  ;;  %378 = vst.msk [vmem:[#allocation3] sm:$0xff] %vm375_vm2, %v377_v6 }
 0x123   : > { %381 = vadd.xlane.f32.xlu0 %v380_v4 }
 0x1ac   : > { %v382_v7 = vpop.xlane.xlu0 %381 }
 0x1ad   : > { %v383_v8 = vrot.slane %v382_v7, 4 }
 0x1af   : > { %v384_v9 = vadd.f32 %v383_v8, %v382_v7 }
 0x1b1   : > { %v385_v10 = vrot.slane %v384_v9, 2 }
 0x1b3   : > { %v386_v11 = vadd.f32 %v385_v10, %v384_v9 }
 0x1b5   : > { %v387_v12 = vrot.slane %v386_v11, 1 }
 0x1b7   : > { %v388_v13 = vadd.f32 %v387_v12, %v386_v11 }
 0x1b9   : > { %916 = vpush %v388_v13 }
 0x1ea   : > { %s917_s10 = spop %916 }
 0x1eb   : > { %s392_s11 = smul.f32 0.125, %s917_s10 }
 0x1ed   : > { %v393_v14 = vstv %s392_s11 }
 0x1ee   : > { %v394_v15 = vsub.f32 %v1596_v3, %v393_v14  ;;  %409 = vst.msk [vmem:[#allocation4] sm:$0xff] %vm379_vm1, %v393_v14 }
 0x1f0   : > { %v395_v16 = vmul.f32 %v394_v15, %v394_v15 }
 0x1f2   : > { %v396_v17 = vsel %vm379_vm1, %v395_v16, 0.0 }
 0x1f3   : > { %397 = vadd.xlane.f32.xlu0 %v396_v17 }
 0x27c   : > { %v398_v18 = vpop.xlane.xlu0 %397 }
 0x27d   : > { %v399_v19 = vrot.slane %v398_v18, 4 }
 0x27f   : > { %v400_v20 = vadd.f32 %v399_v19, %v398_v18 }
 0x281   : > { %v401_v21 = vrot.slane %v400_v20, 2 }
 0x283   : > { %v402_v22 = vadd.f32 %v401_v21, %v400_v20 }
 0x285   : > { %v403_v23 = vrot.slane %v402_v22, 1 }
 0x287   : > { %v404_v24 = vadd.f32 %v403_v23, %v402_v22 }
 0x289   : > { %918 = vpush %v404_v24 }
 0x2ba   : > { %s919_s19 = spop %918 }
 0x2bb   : > { %s408_s24 = smul.f32 0.14285715, %s919_s19 }
 0x2bd   : > { %v410_v25 = vstv %s408_s24 }
 0x2be   : > { %1058 = vrsqrt.f32 %v410_v25  ;;  %vm413_vm3 = vcmp.eq.f32.partialorder %v410_v25, inf  ;;  %v416_v28 = vand.u32 2147483648, %v410_v25  ;;  %vm415_vm4 = vcmp.eq.f32.partialorder %v410_v25, 0.0 }
 0x2cb   : > { %v1059_v26 = vpop.eup %1058 }
 0x2cc   : > { %v412_v27 = vmul.f32 %v1059_v26, %v410_v25 }
 0x2ce   : > { %v414_v29 = vsel %vm413_vm3, %v410_v25, %v412_v27 }
 0x2cf   : > { %v417_v30 = vsel %vm415_vm4, %v416_v28, %v414_v29 }
 0x2d0   : > { %920 = vpush %v417_v30 }
 0x301   : > { %s921_s3 = spop %920 }
 0x302   : > { %v419_v31 = vstv %s921_s3 }
 0x303   : > { %1060 = vrcp.f32 %v419_v31 }
 0x310   : > { %v1061_v32 = vpop.eup %1060 }
 0x311   : > { %922 = vpush %v1061_v32 }
 0x342   : > { %s923_s4 = spop %922 }
 0x343   : > { %v422_v33 = vstv %s923_s4 }
 0x344   : > { %423 = vst.msk [vmem:[#allocation5] sm:$0xff] %vm379_vm1, %v422_v33 }
 0x345 PF: > { %v439_v34 = vld [vmem:[#allocation13 + $0x30] sm:$0xff]  ;;  %v1318_v35 = vmov 0.0   ;;  %v438_v36 = vld [vmem:[#allocation13 + $0x20] sm:$0xff]  ;;  %vm1319_vm5 = vmmov 0   ;;  %v424_v37 = vld [vmem:[#allocation4] sm:$0xff]  ;;  %v1320_v38 = vmov 0  }
 0x346   : > { %894 = vmatprep.subr.mxu0 %v1318_v35  ;;  %902 = vmatprep.mubr.msk.f32.mxu0 %vm1319_vm5, %v1318_v35  ;;  %v425_v39 = vsub.f32 %v1596_v3, %v424_v37  ;;  %v429_v41 = vld [vmem:[#allocation3] sm:$0xff]  ;;  %s1321_s6 = smov 32   ;;  %v436_v44 = vld [vmem:[#allocation13] sm:$0xff]  ;;  %v428_v45 = vld [vmem:[#allocation2] sm:$0xff]  ;;  %vm454_vm6 = vcmask 261120   ;;  %s1322_s1 = smov 96  }
 0x347   : > { %895 = vmatpush3.msra.mxu0 %v439_v34  ;;  %1062 = vset.pattern.permute.xlu0 %v1320_v38  ;;  %v437_v42 = vld [vmem:[#allocation13 + $0x10] sm:$0xff]  ;;  %v873_v46 = vld [vmem:[#allocation11] ss:$0 sm:$0xff]  ;;  %v875_v49 = vld [vmem:[#allocation11 + $0x1] ss:$0 sm:$0xff]  ;;  %vm658_vm7 = vcmask 7168  }
 0x348   : > { %896 = vmatprep.subr.mxu0 %v1318_v35  ;;  %542 = vrot.lane.b32.xlu1 %v429_v41, %s1321_s6  ;;  %v443_v58 = vld [vmem:[#allocation13 + $0x38] sm:$0xff]  ;;  %v442_v59 = vld [vmem:[#allocation13 + $0x28] sm:$0xff]  ;;  %s1323_s25 = smov 64   ;;  %vm687_vm10 = vcmask 523520   ;;  %vm693_vm11 = vcmask 540160  }
 0x349   : > { %897 = vmatpush3.msra.mxu0 %v438_v36  ;;  %905 = vmatprep.subr.mxu1 %v1318_v35  ;;  %v441_v60 = vld [vmem:[#allocation13 + $0x18] sm:$0xff]  ;;  %v440_v61 = vld [vmem:[#allocation13 + $0x8] sm:$0xff] }
 0x34a   : > { %898 = vmatprep.subr.mxu0 %v1318_v35  ;;  %913 = vmatprep.mubr.msk.f32.mxu1 %vm1319_vm5, %v1318_v35  ;;  %v877_v6 = vld [vmem:[#allocation11 + $0x2] ss:$0 sm:$0xff]  ;;  %v880_v10 = vld [vmem:[#allocation11 + $0x5] ss:$0 sm:$0xff]  ;;  %v879_v11 = vld [vmem:[#allocation11 + $0x4] ss:$0 sm:$0xff] }
 0x34b   : > { %v426_v40 = vld [vmem:[#allocation5] sm:$0xff]  ;;  %899 = vmatpush3.msra.mxu0 %v437_v42  ;;  %906 = vmatpush3.msra.mxu1 %v443_v58  ;;  %v881_v18 = vld [vmem:[#allocation11 + $0x3] ss:$0 sm:$0xff] }
 0x34c   : > { %v427_v43 = vmul.f32 %v426_v40, %v425_v39  ;;  %900 = vmatprep.subr.mxu0 %v1318_v35  ;;  %907 = vmatprep.subr.mxu1 %v1318_v35 }
 0x34d   : > { %901 = vmatpush3.msra.mxu0 %v436_v44  ;;  %908 = vmatpush3.msra.mxu1 %v442_v59 }
 0x34e   : > { %446 = vperm.xlu0 %1062, %v427_v43   ;;  %903 = vmatmul.mubr.msk.f32.vlgmr.msra.gmra.mxu0 %vm454_vm6, %v428_v45 }
 0x34f   : > { %909 = vmatprep.subr.mxu1 %v1318_v35 }
 0x350   : > { %910 = vmatpush3.msra.mxu1 %v441_v60 }
 0x351   : > { %911 = vmatprep.subr.mxu1 %v1318_v35 }
 0x352   : > { %912 = vmatpush3.msra.mxu1 %v440_v61 }
 0x3ba   : > { %v543_v1 = vpop.permute.xlu1 %542 }
 0x3c9   : > { %v447_v47 = vpop.permute.xlu0 %446 }
 0x3ca   : > { %v453_v48 = vmul.f32 %v873_v46, %v447_v47 }
 0x40e   : > { %v524_v50 = vpop.f32.mrf.mxu0 }
 0x40f   : > { %v528_v51 = vadd.f32 %v524_v50, %v453_v48 }
 0x410   : > { %v904_v52 = vpop.f32.mrf.mxu0 }
 0x411   : > { %v533_v53 = vadd.f32 %v875_v49, %v528_v51 }
 0x413   : > { %1063 = vtanh.f32 %v533_v53  ;;  %v876_v55 = vmul.f32 -1.442695, %v533_v53 }
 0x415   : > { %1065 = vpow2.f32 %v876_v55 }
 0x420   : > { %v1064_v54 = vpop.eup %1063 }
 0x421   : > { %547 = vrot.lane.b32.xlu0 %v1064_v54, %s1321_s6 }
 0x422   : > { %v1066_v56 = vpop.eup %1065 }
 0x423   : > { %v537_v57 = vadd.f32 1.0, %v1066_v56 }
 0x425   : > { %1067 = vrcp.f32 %v537_v57 }
 0x432   : > { %v1068_v62 = vpop.eup %1067 }
 0x433   : > { %v545_v2 = vmul.f32 %v1068_v62, %v543_v1 }
 0x493   : > { %v548_v63 = vpop.permute.xlu0 %547 }
 0x494   : > { %v550_v0 = vmul.f32 %v1068_v62, %v548_v63 }
 0x496   : > { %552 = vrot.lane.b32.xlu1 %v550_v0, %s1321_s6 }
 0x508   : > { %v553_v3 = vpop.permute.xlu1 %552 }
 0x509   : > { %v555_v4 = vadd.f32 %v553_v3, %v545_v2 }
 0x50b   : > { %567 = vrot.lane.b32.xlu0 %v555_v4, %s1322_s1  ;;  %1069 = vtanh.f32 %v555_v4 }
 0x518   : > { %v1070_v17 = vpop.eup %1069 }
 0x57d   : > { %v568_v5 = vpop.permute.xlu0 %567 }
 0x57e   : > { %685 = vst.msk [vmem:[#allocation3] sm:$0xff] %vm454_vm6, %v568_v5  ;;  %914 = vmatmul.mubr.msk.f32.vlgmr.msra.gmra.mxu1 %vm454_vm6, %v568_v5 }
 0x63e   : > { %v637_v7 = vpop.f32.mrf.mxu1 }
 0x63f   : > { %v638_v8 = vadd.f32 %v877_v6, %v637_v7 }
 0x640   : > { %v915_v9 = vpop.f32.mrf.mxu1 }
 0x641   : > { %v641_v12 = vmax.f32 %v638_v8, 0.0 }
 0x643   : > { %v654_v13 = vmul.f32 %v880_v10, %v641_v12  ;;  %v646_v14 = vmul.f32 %v879_v11, %v641_v12 }
 0x645   : > { %v655_v15 = vsel %vm454_vm6, %v654_v13, 0.0  ;;  %v647_v16 = vsel %vm454_vm6, %v646_v14, 0.0 }
 0x646   : > { %656 = vadd.xlane.f32.xlu0 %v655_v15  ;;  %648 = vadd.xlane.f32.xlu1 %v647_v16 }
 0x65c   : > { %558 = vrot.lane.b32.xlu0 %v1070_v17, %s1321_s6 }
 0x6cf   : > { %v657_v19 = vpop.xlane.xlu0 %656  ;;  %v649_v20 = vpop.xlane.xlu1 %648 }
 0x6d0   : > { %v659_v21 = vsel %vm658_vm7, %v649_v20, %v657_v19 }
 0x6d1   : > { %v664_v22 = vadd.f32 %v881_v18, %v659_v21 }
 0x6d3   : > { %v666_v23 = vmin.f32 %v664_v22, 20.0  ;;  %v559_v24 = vpop.permute.xlu0 %558  ;;  %vm665_vm9 = vcmp.gt.f32.partialorder %v664_v22, 20.0 }
 0x6d4   : > { %v561_v25 = vmul.f32 %v1068_v62, %v559_v24 }
 0x6d5   : > { %v667_v26 = vmul.f32 1.442695, %v666_v23 }
 0x6d6   : > { %680 = vrot.lane.b32.xlu1 %v561_v25, %s1323_s25 }
 0x6d7   : > { %1071 = vpow2.f32 %v667_v26 }
 0x6e4   : > { %v1072_v27 = vpop.eup %1071 }
 0x6e5   : > { %v669_v28 = vadd.f32 1.0, %v1072_v27  ;;  %v672_v29 = vmul.f32 -0.5, %v1072_v27  ;;  %v675_v31 = vand.u32 2147483647, %v1072_v27 }
 0x6e7   : > { %1073 = vlog2.f32 %v669_v28  ;;  %v673_v30 = vadd.f32 1.0, %v672_v29  ;;  %vm676_vm8 = vcmp.lt.f32.partialorder %v675_v31, 0.0004427343 }
 0x6e9   : > { %v674_v34 = vmul.f32 %v1072_v27, %v673_v30 }
 0x6f4   : > { %v1074_v32 = vpop.eup %1073 }
 0x6f5   : > { %v671_v33 = vmul.f32 0.6931472, %v1074_v32 }
 0x6f7   : > { %v677_v35 = vsel %vm676_vm8, %v674_v34, %v671_v33 }
 0x6f8   : > { %v678_v36 = vsel %vm665_vm9, %v664_v22, %v677_v35 }
 0x6f9   : > { %690 = vrot.lane.b32.xlu1 %v678_v36, %s1323_s25 }
 0x748   : > { %v681_v37 = vpop.permute.xlu1 %680 }
 0x749   : > { %683 = vst.msk [vmem:[#allocation2] sm:$0xff] %vm454_vm6, %v681_v37  ;;  %686 = vst.msk [vmem:[%s1594_s18] sm:$0xff] %vm454_vm6, %v681_v37 }
 0x74a   : > { %688 = vst.msk [vmem:[%s1594_s18] sm:$0xff] %vm687_vm10, %v555_v4 }
 0x76b   : > { %v691_v38 = vpop.permute.xlu1 %690 }
 0x76c   : > { %694 = vst.msk [vmem:[%s1594_s18] sm:$0xff] %vm693_vm11, %v691_v38 }
 0x76d PF: > { %s22_s28 = sadd.s32 1, %s1309_s28   ;;  %s1719_s18 = sld [smem:[#allocation17_spill]] }
 0x76e   : > { %p19_p2 = scmp.ge.s32.totalorder %s22_s28, 18   ;;  %s1720_s14 = sld [smem:[#allocation22_spill]] }
 0x76f   : > { %s1721_s19 = smov %s1277_s20  ;;  %s1722_s20 = smov %s1524_s15 }
 0x770   : > { %s1723_s21 = smov %s1285_s22  ;;  %s1724_s22 = smov %s1289_s23 }
 0x771   : > { %s1725_s23 = smov %s1527_s5  ;;  %s1726_s24 = smov %s1301_s26 }
 0x772   : > { %s1727_s25 = smov %s1305_s27  ;;  %s1729_s27 = smov %s1735_s7 }
 0x773   :  { %21 = sbr.rel (!%p19_p2) target bundleno = 15 (0xf), region = 116 }
 0x774   : > { %s1728_s26 = smov %s1720_s14 }
 0x778   :  { %722 = vsyncpa [#allocation7], 1 }
 0x779   :  { %724 = vsyncpa [#allocation7 + $0x1], 1 }
 0x77a   :  { %725 = vsyncpa [#allocation9], 1 }
 0x77b   :  { %727 = vsyncpa [#allocation9 + $0x1], 1 }
 0x77c   :  { %728 = vsyncpa [#allocation12], 1 }

</bundles_post_ra>
